<compile_context>
chip_gen: v7x
topology: tpu7x:2x2x1
jax: 0.10.0
libtpu: 0.0.40
codegen_flags: <defaults>
</compile_context>

<pallas_src>
import functools
import numpy as np
import jax
import jax.numpy as jnp
from jax import lax
from jax.experimental import pallas as pl
from jax.experimental.pallas import tpu as pltpu


# ------------------------------- utilities --------------------------------- #
def _round_up(x, m):
    return ((x + m - 1) // m) * m


def _vmem_limit_bytes():
    """Generation-aware VMEM budget: ~75% of physical VMEM, 48 MiB fallback."""
    try:
        cap = getattr(pltpu.get_tpu_info(), "vmem_capacity_bytes", None)
        if cap:
            return int(cap) * 3 // 4
    except Exception:
        pass
    return 48 * 1024 * 1024


def _choose_row_tile(m, hidden, A, Hpad, vmem_limit, max_tm=2048):
    """Largest row tile (multiple of 8, <= max_tm) whose double-buffered
    blocks fit the VMEM budget next to the resident weights."""
    resident = 2 * (hidden * 2 * 2 * A          # w_cat (bf16), assume 2 buffers
                    + 2 * A * 4                 # bias
                    + A * Hpad * 4)             # block-diag reading head
    budget = max(vmem_limit - resident, 4 << 20)
    per_row = 2 * (hidden * 2                   # x tile (bf16)
                   + 2 * A * 4                  # kv value
                   + A * 4                      # V out tile
                   + Hpad * 4)                  # dp out tile
    tm = min(max_tm, _round_up(m, 8))
    while tm > 8 and tm * per_row > budget:
        tm //= 2
    return max(8, (tm // 8) * 8)


def _choose_l_tile(L, A, idx_cols, vmem_limit, max_tl=512):
    """Output L-tile for the gather kernel: V1 stays resident, output / index
    tiles are double-buffered.  Keeps v7x (64 MiB) comfortable."""
    resident = 2 * L * A * 4                    # resident V1 (+ slack)
    budget = max(vmem_limit - resident, 4 << 20)
    per_row = 2 * (A * 4 + idx_cols * 4) + 4 * L   # out + idx tiles + one-hot temp
    tl = min(max_tl, _round_up(L, 8))
    while tl > 8 and tl * per_row > budget:
        tl //= 2
    return max(8, (tl // 8) * 8)


# ----------------------------- Pallas kernels ------------------------------ #
def _kv_proj_kernel(x_ref, w_ref, b_ref, rhbd_ref, v_ref, dp_ref, *, A):
    # x: (tm, hidden) bf16   w: (hidden, 2A) bf16   b: (1, 2A) f32
    # rh_bd: (A, Hpad) f32 block-diagonal reading head (lane-padded to 128)
    kv = jnp.dot(x_ref[...], w_ref[...], preferred_element_type=jnp.float32)
    kv = jnp.maximum(kv + b_ref[...], 0.0)          # ReLU on both projections (f32)
    v_ref[...] = kv[:, A:].astype(v_ref.dtype)      # relu(x @ wv + bv)
    # dot_products = einsum('blhn,hn->blh') as one MXU matmul (lane-dense out).
    dp_ref[...] = jnp.dot(kv[:, :A], rhbd_ref[...],
                          preferred_element_type=jnp.float32).astype(dp_ref.dtype)


def _gather_ws_kernel(idx_ref, v1_ref, bw_ref, o_ref, *, R, H, hd):
    # idx: (TL, 2R*H) int32 (VMEM)   v1: (L, A) f32 resident   bw: (H, 2R) f32
    # o:   (TL, A) f32  -- one full-width, lane-dense store per tile.
    tl = o_ref.shape[0]
    L = v1_ref.shape[0]
    idx = idx_ref[...]
    v1 = v1_ref[...]
    bw = bw_ref[...]
    cols = lax.broadcasted_iota(jnp.int32, (tl, L), 1)
    pieces = []
    for h in range(H):                       # H, 2R are small & static
        g = jnp.zeros((tl, L), jnp.float32)
        for s in range(2 * R):               # slots: [0..R) fwd, [R..2R) bwd
            c = s * H + h
            sel = idx[:, c:c + 1] == cols                       # (TL, L) one-hot
            g = g + jnp.where(sel, bw[h:h + 1, s:s + 1], 0.0)   # fold bw[h,s] in
        # weighted gather == MXU matmul against resident V1 (out-of-range / padded
        # indices simply select nothing -> no OOB reads possible).
        pieces.append(jnp.dot(g, v1[:, h * hd:(h + 1) * hd],
                              preferred_element_type=jnp.float32))
    o_ref[...] = jnp.concatenate(pieces, axis=-1).astype(o_ref.dtype)


# ----------------------------- kernel wrappers ------------------------------ #
def kv_projection(x2d, w_cat, b_cat, rh_bd, *, A, tm, vmem_limit):
    Mp, hidden = x2d.shape
    A2 = w_cat.shape[1]
    Hp = rh_bd.shape[1]
    # NOTE: constant-index blocks (w_cat / bias / rh_bd) could be forced to a
    # single buffer (pl.Buffered(1)) to save VMEM; left default for safety.
    return pl.pallas_call(
        functools.partial(_kv_proj_kernel, A=A),
        out_shape=(jax.ShapeDtypeStruct((Mp, A), jnp.float32),
                   jax.ShapeDtypeStruct((Mp, Hp), jnp.float32)),
        grid=(Mp // tm,),
        in_specs=[pl.BlockSpec((tm, hidden), lambda i: (i, 0)),
                  pl.BlockSpec((hidden, A2), lambda i: (0, 0)),
                  pl.BlockSpec((1, A2), lambda i: (0, 0)),
                  pl.BlockSpec((A, Hp), lambda i: (0, 0))],
        out_specs=(pl.BlockSpec((tm, A), lambda i: (i, 0)),
                   pl.BlockSpec((tm, Hp), lambda i: (i, 0))),
        compiler_params=pltpu.CompilerParams(
            dimension_semantics=("parallel",),
            vmem_limit_bytes=vmem_limit),
    )(x2d, w_cat, b_cat[None, :], rh_bd)


def gather_weighted_sum(idx_flat, v1_bla, bw2d, *, R, H, hd, tl, vmem_limit):
    bs, Lp, idx_cols = idx_flat.shape
    L = v1_bla.shape[1]
    A = H * hd
    return pl.pallas_call(
        functools.partial(_gather_ws_kernel, R=R, H=H, hd=hd),
        out_shape=jax.ShapeDtypeStruct((bs, Lp, A), jnp.float32),
        grid=(bs, Lp // tl),
        in_specs=[pl.BlockSpec((None, tl, idx_cols), lambda b, t: (b, t, 0)),
                  pl.BlockSpec((None, L, A), lambda b, t: (b, 0, 0)),
                  pl.BlockSpec((H, 2 * R), lambda b, t: (0, 0))],
        out_specs=pl.BlockSpec((None, tl, A), lambda b, t: (b, t, 0)),
        compiler_params=pltpu.CompilerParams(
            dimension_semantics=("parallel", "parallel"),
            vmem_limit_bytes=vmem_limit),
    )(idx_flat, v1_bla, bw2d)


# ------------------------------ forward pass ------------------------------- #
def roberta_self_attention_match_kv(hidden_states, params, n_heads, head_dim,
                                    n_registers, return_aux=False):
    bs, L, hidden = hidden_states.shape
    H, hd, R = n_heads, head_dim, n_registers
    A = H * hd
    M = bs * L
    vlim = _vmem_limit_bytes()

    # Fused K/V projection: one wide bf16 MXU matmul + ReLU + dp matmul.
    w_cat = jnp.concatenate([params["wk"], params["wv"]], axis=1).astype(jnp.bfloat16)
    b_cat = jnp.concatenate([params["bk"], params["bv"]], axis=0).astype(jnp.float32)
    Hpad = _round_up(max(H, 1), 128)                      # lane-dense dp output
    eye = jnp.eye(H, Hpad, dtype=jnp.float32)
    rh_bd = (params["reading_head"].astype(jnp.float32)[:, :, None]
             * eye[:, None, :]).reshape(A, Hpad)          # block-diagonal (A, Hpad)

    tm = _choose_row_tile(M, hidden, A, Hpad, vlim)
    Mp = _round_up(M, tm)
    x2d = hidden_states.reshape(M, hidden).astype(jnp.bfloat16)
    if Mp > M:
        x2d = jnp.pad(x2d, ((0, Mp - M), (0, 0)))
    V_full, dp_full = kv_projection(x2d, w_cat, b_cat, rh_bd,
                                    A=A, tm=tm, vmem_limit=vlim)
    V1_2d = V_full[:M]
    dp_2d = dp_full[:M, :H]                   # f32 accumulation; threshold in f32
    dp = dp_2d.reshape(bs, L, H)
    valid = dp > 0.5                          # default attn_var branch

    # TODO(synk): the serial L-step register recurrence stays in plain JAX
    # (lax.scan); an in-kernel SMEM recurrence fused with the threshold would
    # remove this XLA-side critical path at long L.
    regs0 = jnp.zeros((bs, R, H), jnp.int32)

    # ---- forward memory map ----
    def fwd_step(regs, inp):
        l, v_l = inp
        shifted = jnp.concatenate(
            [jnp.full((bs, 1, H), l, jnp.int32), regs[:, :R - 1, :]], axis=1)
        new_regs = jnp.where(v_l[:, None, :], shifted, regs)
        return new_regs, new_regs

    ls_f = jnp.arange(1, L, dtype=jnp.int32)
    valid_f = jnp.moveaxis(valid[:, 1:, :], 1, 0)
    _, regs_f = lax.scan(fwd_step, regs0, (ls_f, valid_f))
    fidx = jnp.concatenate([regs0[:, None], jnp.moveaxis(regs_f, 0, 1)], axis=1)

    # ---- backward memory map ----
    regs_last = jnp.concatenate(
        [jnp.where(valid[:, L - 1], L - 1, 0).astype(jnp.int32)[:, None, :],
         jnp.zeros((bs, R - 1, H), jnp.int32)], axis=1)

    def bwd_step(regs, inp):
        l, v_l = inp
        shifted = jnp.concatenate(
            [jnp.full((bs, 1, H), l + 1, jnp.int32), regs[:, :R - 1, :]], axis=1)
        new_regs = jnp.where(v_l[:, None, :], shifted, regs)
        return new_regs, new_regs

    ls_b = jnp.arange(L - 2, 0, -1, dtype=jnp.int32)
    valid_b = jnp.moveaxis(valid[:, 1:L - 1, :], 1, 0)[::-1]
    _, regs_b = lax.scan(bwd_step, regs_last, (ls_b, valid_b))
    bidx = jnp.concatenate([jnp.zeros((bs, 1, R, H), jnp.int32),
                            jnp.moveaxis(regs_b[::-1], 0, 1),
                            regs_last[:, None]], axis=1)          # (bs, L, R, H)

    # ---- fused weighted gather (one-hot MXU matmul) in a Pallas kernel ----
    idx_all = jnp.concatenate([fidx, bidx], axis=2).astype(jnp.int32)  # (bs,L,2R,H)
    idx_flat = idx_all.reshape(bs, L, 2 * R * H)
    tl = _choose_l_tile(L, A, 2 * R * H, vlim)
    Lp = _round_up(L, tl)
    if Lp > L:
        idx_flat = jnp.pad(idx_flat, ((0, 0), (0, Lp - L), (0, 0)))
    bw2d = params["bidirection_weight"].reshape(H, 2 * R).astype(jnp.float32)
    ctx_full = gather_weighted_sum(idx_flat, V1_2d.reshape(bs, L, A), bw2d,
                                   R=R, H=H, hd=hd, tl=tl, vmem_limit=vlim)
    ctx = ctx_full[:, :L, :]

    if return_aux:
        return ctx, {"V1_2d": V1_2d, "dp_2d": dp_2d, "valid": valid}
    return ctx


# ---------------------- reference for the post-projection glue -------------- #
def reference_postproc(V1, valid, bw, n_registers):
    """Loop-based replica of the torch recurrence/gather/weighted-sum,
    consuming the kernel-produced V1 and valid_mask (avoids threshold flips)."""
    V1 = np.asarray(V1)
    valid = np.asarray(valid)
    bs, L, H, hd = V1.shape
    R = n_registers
    fm = np.zeros((bs, L, R + 1, H), np.int64)
    fm[:, :, 0] = np.arange(1, L + 1)[None, :, None]
    for l in range(1, L):
        fm[:, l, 1:] = np.where(valid[:, l][:, None, :], fm[:, l - 1, :-1], fm[:, l - 1, 1:])
    bm = np.zeros((bs, L, R + 1, H), np.int64)
    bm[:, :, 0] = np.arange(0, L)[None, :, None]
    bm[:, L - 1, 1] = np.where(valid[:, L - 1], L - 1, 0)
    for l in range(L - 2, 0, -1):
        bm[:, l, 1:] = np.where(valid[:, l][:, None, :], bm[:, l + 1, :-1], bm[:, l + 1, 1:])
    fidx, bidx = fm[:, :, 1:], bm[:, :, 1:]

    def gather(idx):
        out = np.zeros((bs, L, R, H, hd), np.float32)
        for b in range(bs):
            for l in range(L):
                for r in range(R):
                    for h in range(H):
                        out[b, l, r, h] = V1[b, idx[b, l, r, h], h]
        return out

    V_cat = np.concatenate([gather(fidx), gather(bidx)], axis=2)   # (bs,L,2R,H,hd)
    new_states = (np.transpose(V_cat, (0, 1, 3, 4, 2))
                  * np.asarray(bw).reshape(1, 1, H, 1, 2 * R))
    return new_states.sum(-1).reshape(bs, L, H * hd)


# ----------------------------------- main ----------------------------------- #
if __name__ == "__main__":
    # module hyper-params (args)
    bs, L = 2, 8
    hidden_size = 32
    n_heads, head_dim = 4, 8
    n_registers = 2
    A = n_heads * head_dim

    key = jax.random.PRNGKey(0)
    k_x, k_wk, k_bk, k_wv, k_bv, k_rh, k_bw = jax.random.split(key, 7)
    bound = 1.0 / np.sqrt(hidden_size)
    params = {
        "wk": jax.random.uniform(k_wk, (hidden_size, A), jnp.float32, -bound, bound),
        "bk": jax.random.uniform(k_bk, (A,), jnp.float32, -bound, bound),
        "wv": jax.random.uniform(k_wv, (hidden_size, A), jnp.float32, -bound, bound),
        "bv": jax.random.uniform(k_bv, (A,), jnp.float32, -bound, bound),
        # xavier_normal_ on (n_heads, head_dim)
        "reading_head": jax.random.normal(k_rh, (n_heads, head_dim), jnp.float32)
                        * np.sqrt(2.0 / (n_heads + head_dim)),
        # nominal init is the constant 1/(2R); perturb so the per-(head, slot)
        # weight indexing in-kernel is actually exercised.
        "bidirection_weight": (jnp.ones((1, 1, n_heads, 1, 2 * n_registers), jnp.float32)
                               * (1.0 / n_registers / 2.0)
                               + 0.05 * jax.random.normal(
                                   k_bw, (1, 1, n_heads, 1, 2 * n_registers), jnp.float32)),
    }
    hidden_states = jax.random.normal(k_x, (bs, L, hidden_size), jnp.float32)

    ctx, aux = roberta_self_attention_match_kv(hidden_states, params, n_heads,
                                               head_dim, n_registers,
                                               return_aux=True)
    ctx = jax.block_until_ready(ctx)
    assert ctx.shape == (bs, L, A)
    assert bool(jnp.all(jnp.isfinite(ctx)))

    # --- sanity-check the fused projection kernel (bf16 inputs -> loose tol) ---
    x2d_np = np.asarray(hidden_states).reshape(bs * L, hidden_size)
    k_np = np.maximum(x2d_np @ np.asarray(params["wk"]) + np.asarray(params["bk"]), 0.0)
    v_np = np.maximum(x2d_np @ np.asarray(params["wv"]) + np.asarray(params["bv"]), 0.0)
    dp_np = (k_np.reshape(bs * L, n_heads, head_dim)
             * np.asarray(params["reading_head"])[None]).sum(-1)
    assert np.allclose(np.asarray(aux["V1_2d"]), v_np, atol=3e-2, rtol=3e-2)
    assert np.allclose(np.asarray(aux["dp_2d"]), dp_np, atol=3e-2, rtol=3e-2)

    # --- verify scans + fused gather/weighted-sum against a loop reference ---
    V1 = np.asarray(aux["V1_2d"]).reshape(bs, L, n_heads, head_dim)
    valid = np.asarray(aux["valid"])
    ref = reference_postproc(V1, valid, params["bidirection_weight"], n_registers)
    assert np.allclose(np.asarray(ctx), ref, atol=1e-4, rtol=1e-4)

    print("KERNEL_OK")
</pallas_src>

<mosaic_0001>
module attributes {stable_mosaic.version = 11 : i64} {
  func.func @_kv_proj_kernel(%arg0: i32, %arg1: memref<16x32xbf16, #tpu.memory_space<vmem>>, %arg2: memref<32x64xbf16, #tpu.memory_space<vmem>>, %arg3: memref<1x64xf32, #tpu.memory_space<vmem>>, %arg4: memref<32x128xf32, #tpu.memory_space<vmem>>, %arg5: memref<16x32xf32, #tpu.memory_space<vmem>>, %arg6: memref<16x128xf32, #tpu.memory_space<vmem>>) attributes {dimension_semantics = [#tpu.dimension_semantics<parallel>], iteration_bounds = array<i64: 1>, scalar_prefetch = 0 : i64, scratch_operands = 0 : i64, tpu.core_type = #tpu.core_type<tc>, window_params = [{transform_indices = @transform_0, window_bounds = array<i64: 16, 32>}, {pipeline_mode = #tpu.pipeline_mode<synchronous>, transform_indices = @transform_1, window_bounds = array<i64: 32, 64>}, {pipeline_mode = #tpu.pipeline_mode<synchronous>, transform_indices = @transform_2, window_bounds = array<i64: 1, 64>}, {pipeline_mode = #tpu.pipeline_mode<synchronous>, transform_indices = @transform_3, window_bounds = array<i64: 32, 128>}, {transform_indices = @transform_4, window_bounds = array<i64: 16, 32>}, {transform_indices = @transform_5, window_bounds = array<i64: 16, 128>}]} {
    %c0 = arith.constant 0 : index
    %c0_0 = arith.constant 0 : index
    %0 = vector.load %arg1[%c0, %c0_0] : memref<16x32xbf16, #tpu.memory_space<vmem>>, vector<16x32xbf16>
    %c0_1 = arith.constant 0 : index
    %c0_2 = arith.constant 0 : index
    %1 = vector.load %arg2[%c0_1, %c0_2] : memref<32x64xbf16, #tpu.memory_space<vmem>>, vector<32x64xbf16>
    %cst = arith.constant dense<0.000000e+00> : vector<16x64xf32>
    %2 = tpu.matmul %0, %1, %cst {dimension_numbers = #tpu.dot_dimension_numbers<[1], [0], [0], [1], [0, 0, 1, 1], [], []>} : vector<16x32xbf16>, vector<32x64xbf16>, vector<16x64xf32> -> vector<16x64xf32>
    %c0_3 = arith.constant 0 : index
    %c0_4 = arith.constant 0 : index
    %3 = vector.load %arg3[%c0_3, %c0_4] : memref<1x64xf32, #tpu.memory_space<vmem>>, vector<1x64xf32>
    %4 = vector.broadcast %3 : vector<1x64xf32> to vector<16x64xf32>
    %5 = arith.addf %2, %4 : vector<16x64xf32>
    %cst_5 = arith.constant 0.000000e+00 : f32
    %6 = vector.broadcast %cst_5 : f32 to vector<16x64xf32>
    %7 = arith.maximumf %5, %6 : vector<16x64xf32>
    %8 = vector.extract_strided_slice %7 {offsets = [0, 32], sizes = [16, 32], strides = [1, 1]} : vector<16x64xf32> to vector<16x32xf32>
    %c0_6 = arith.constant 0 : index
    %c0_7 = arith.constant 0 : index
    %9 = vector.load %arg5[%c0_6, %c0_7] : memref<16x32xf32, #tpu.memory_space<vmem>>, vector<16x32xf32>
    tpu.vector_store %arg5[%c0_6, %c0_7], %8 {strides = array<i32>} : memref<16x32xf32, #tpu.memory_space<vmem>>, vector<16x32xf32>,
    %10 = vector.extract_strided_slice %7 {offsets = [0, 0], sizes = [16, 32], strides = [1, 1]} : vector<16x64xf32> to vector<16x32xf32>
    %c0_8 = arith.constant 0 : index
    %c0_9 = arith.constant 0 : index
    %11 = vector.load %arg4[%c0_8, %c0_9] : memref<32x128xf32, #tpu.memory_space<vmem>>, vector<32x128xf32>
    %cst_10 = arith.constant dense<0.000000e+00> : vector<16x128xf32>
    %12 = tpu.matmul %10, %11, %cst_10 {dimension_numbers = #tpu.dot_dimension_numbers<[1], [0], [0], [1], [0, 0, 1, 1], [], []>} : vector<16x32xf32>, vector<32x128xf32>, vector<16x128xf32> -> vector<16x128xf32>
    %c0_11 = arith.constant 0 : index
    %c0_12 = arith.constant 0 : index
    %13 = vector.load %arg6[%c0_11, %c0_12] : memref<16x128xf32, #tpu.memory_space<vmem>>, vector<16x128xf32>
    tpu.vector_store %arg6[%c0_11, %c0_12], %12 {strides = array<i32>} : memref<16x128xf32, #tpu.memory_space<vmem>>, vector<16x128xf32>,
    return
  }
  func.func @transform_0(%arg0: i32) -> (i32, i32) {
    %c0_i32 = arith.constant 0 : i32
    %c0_i32_0 = arith.constant 0 : i32
    return %arg0, %c0_i32 : i32, i32
  }
  func.func @transform_1(%arg0: i32) -> (i32, i32) {
    %c0_i32 = arith.constant 0 : i32
    %c0_i32_0 = arith.constant 0 : i32
    %c0_i32_1 = arith.constant 0 : i32
    return %c0_i32, %c0_i32_0 : i32, i32
  }
  func.func @transform_2(%arg0: i32) -> (i32, i32) {
    %c0_i32 = arith.constant 0 : i32
    %c0_i32_0 = arith.constant 0 : i32
    %c0_i32_1 = arith.constant 0 : i32
    return %c0_i32, %c0_i32_0 : i32, i32
  }
  func.func @transform_3(%arg0: i32) -> (i32, i32) {
    %c0_i32 = arith.constant 0 : i32
    %c0_i32_0 = arith.constant 0 : i32
    %c0_i32_1 = arith.constant 0 : i32
    return %c0_i32, %c0_i32_0 : i32, i32
  }
  func.func @transform_4(%arg0: i32) -> (i32, i32) {
    %c0_i32 = arith.constant 0 : i32
    %c0_i32_0 = arith.constant 0 : i32
    return %arg0, %c0_i32 : i32, i32
  }
  func.func @transform_5(%arg0: i32) -> (i32, i32) {
    %c0_i32 = arith.constant 0 : i32
    %c0_i32_0 = arith.constant 0 : i32
    return %arg0, %c0_i32 : i32, i32
  }
}

</mosaic_0001>

<bundles_post_ra>
// kernel: tpu_custom_call.1
= control target key start
LH: loop header
LB: loop body
LE: loop exit
PB: predicated region body
PF: predicated region fallthrough
CT: control target
= control target key end

     0   :  { %11 = vsyncpa [#allocation3], 0  ;;  %s571_s0 = inlined_call_operand.hbm [shape: bf16[16,32], index: 0, kind: input, shape index: {}]   ;;  %s572_s1 = inlined_call_operand.hbm [shape: bf16[32,64], index: 1, kind: input, shape index: {}]   ;;  %s573_s2 = inlined_call_operand.vmem [shape: f32[1,64], index: 2, kind: input, shape index: {}]   ;;  %s574_s3 = inlined_call_operand.hbm [shape: f32[32,128], index: 3, kind: input, shape index: {}]   ;;  %s575_s4 = inlined_call_operand.hbm [shape: f32[16,32], index: 4, kind: output, shape index: {0}]   ;;  %s576_s5 = inlined_call_operand.hbm [shape: f32[16,128], index: 5, kind: output, shape index: {1}]  }
   0x1   :  { %12 = vsyncpa [#allocation6], 0 }
   0x2   :  { %13 = vsyncpa [#allocation4], 0 }
   0x3   :  { %14 = vsyncpa [#allocation10], 0  ;;  %s445_s18 = smov [#allocation5]   ;;  %s446_s20 = smov [#allocation2]  }
   0x4   :  { %s32_s19 = sshll.u32 %s445_s18, 4  ;;  %s20_s21 = sshll.u32 %s446_s20, 4  ;;  %s33_s19 = int_to_ptr.vmem [resolvable:$true] %s32_s19  ;;  %s487_s21 = int_to_ptr.vmem [resolvable:$true] %s20_s21 }
   0x5   :  { %s327_s24 = scalar_lea.hbm %s572_s1, 256 }
   0x6   :  { %p328_p0 = scmp.ne.s32.totalorder %s572_s1, %s327_s24  ;;  %p331_p1 = scmp.lt.u32.totalorder %s327_s24, %s572_s1 }
   0x8   :  { %p333_p2 = pnand %p331_p1, %p328_p0 }
   0xa   :  { %336 = shalt.err (!%p333_p2)
}
   0xb   :  { %s337_s29 = scalar_lea.vmem %s33_s19, 256  ;;  %p342_p4 = scmp.lt.s32.totalorder %s33_s19, %s33_s19 }
   0xc   :  { %p338_p3 = scmp.ne.s32.totalorder %s33_s19, %s337_s29  ;;  %p343_p5 = scmp.lt.s32.totalorder %s337_s29, %s337_s29 }
   0xe   :  { %p344_p6 = por %p343_p5, %p342_p4 }
  0x10   :  { %p345_p7 = pnand %p344_p6, %p338_p3 }
  0x12   :  { %348 = shalt.err (!%p345_p7)
}
  0x13   :  { %s447_s30 = smov 64   ;;  %s448_s6 = smov 4  }
  0x14   :  { %38 = dma.hbm_to_vmem [thread:$0]  %s572_s1, 256, %s33_s19, [#allocation6], %s447_s30, %s447_s30, %s448_s6  }
  0x15   :  { %s349_s11 = scalar_lea.hbm %s571_s0, 128 }
  0x16   :  { %p350_p8 = scmp.ne.s32.totalorder %s571_s0, %s349_s11  ;;  %p353_p9 = scmp.lt.u32.totalorder %s349_s11, %s571_s0 }
  0x18   :  { %p355_p10 = pnand %p353_p9, %p350_p8 }
  0x1a   :  { %358 = shalt.err (!%p355_p10)
}
  0x1b   :  { %s359_s16 = scalar_lea.vmem %s487_s21, 128  ;;  %p364_p12 = scmp.lt.s32.totalorder %s487_s21, %s487_s21 }
  0x1c   :  { %p360_p11 = scmp.ne.s32.totalorder %s487_s21, %s359_s16  ;;  %p365_p13 = scmp.lt.s32.totalorder %s359_s16, %s359_s16 }
  0x1e   :  { %p366_p0 = por %p365_p13, %p364_p12 }
  0x20   :  { %p367_p1 = pnand %p366_p0, %p360_p11 }
  0x22   :  { %370 = shalt.err (!%p367_p1)
}
  0x23   :  { %26 = dma.hbm_to_vmem [thread:$0]  %s571_s0, 128, %s487_s21, [#allocation3], %s447_s30, %s447_s30, %s448_s6  }
  0x24   :  { %s449_s18 = smov [#allocation7]   ;;  %s371_s23 = scalar_lea.hbm %s574_s3, 512 }
  0x25   :  { %s46_s19 = sshll.u32 %s449_s18, 4  ;;  %p372_p2 = scmp.ne.s32.totalorder %s574_s3, %s371_s23  ;;  %s47_s19 = int_to_ptr.vmem [resolvable:$true] %s46_s19 }
  0x26   :  { %p375_p3 = scmp.lt.u32.totalorder %s371_s23, %s574_s3 }
  0x28   :  { %p377_p4 = pnand %p375_p3, %p372_p2 }
  0x2a   :  { %380 = shalt.err (!%p377_p4)
}
  0x2b   :  { %s381_s28 = scalar_lea.vmem %s47_s19, 512  ;;  %p386_p6 = scmp.lt.s32.totalorder %s47_s19, %s47_s19 }
  0x2c   :  { %p382_p5 = scmp.ne.s32.totalorder %s47_s19, %s381_s28  ;;  %p387_p7 = scmp.lt.s32.totalorder %s381_s28, %s381_s28 }
  0x2e   :  { %p388_p8 = por %p387_p7, %p386_p6 }
  0x30   :  { %p389_p9 = pnand %p388_p8, %p382_p5 }
  0x32   :  { %392 = shalt.err (!%p389_p9)
}
  0x33   :  { %s450_s0 = smov 128   ;;  %s451_s21 = smov 8  }
  0x34   :  { %52 = dma.hbm_to_vmem [thread:$0]  %s574_s3, 512, %s47_s19, [#allocation6], %s450_s0, %s450_s0, %s451_s21  }
  0x35   :  { %437 = dma.done.wait [#allocation3], 128  }
  0x36   :  { %438 = vsyncadd [#allocation3], 4294967168 }
  0x37   :  { %439 = dma.done.wait [#allocation6], 768  }
  0x38   :  { %440 = vsyncadd [#allocation6], 4294966528  ;;  %v452_v0 = vmov 0.0   ;;  %vm453_vm0 = vmmov 0   ;;  %v324_v1 = vld [vmem:[#allocation5] sm:$0xff]   ;;  %v325_v2 = vld [vmem:[#allocation5 + $0x8] sm:$0xff]  }
  0x39   :  { %285 = vmatprep.subr.bf16.mxu0 %v452_v0  ;;  %289 = vmatprep.mubr.msk.bf16.mxu0 %vm453_vm0, %v452_v0  ;;  %v150_v3 = vld [vmem:[#allocation7] sm:$0xff]  ;;  %v151_v4 = vld [vmem:[#allocation7 + $0x8] sm:$0xff]  ;;  %vm93_vm1 = vcmask 261120   ;;  %v152_v7 = vld [vmem:[#allocation7 + $0x10] sm:$0xff]  ;;  %s454_s7 = smov 96   ;;  %s455_s8 = smov [#allocation8]  }
  0x3a   :  { %286 = vmatpush3.bf16.msra.mxu0 %v324_v1  ;;  %v304_v5 = vpack.c.bf16 %v151_v4, %v150_v3  ;;  %v326_v6 = vld [vmem:[#allocation2] sm:$0xff]   ;;  %v153_v8 = vld [vmem:[#allocation7 + $0x18] sm:$0xff]  ;;  %s240_s9 = sshll.u32 %s455_s8, 4  ;;  %s241_s9 = int_to_ptr.vmem [resolvable:$true] %s240_s9 }
  0x3b   :  { %287 = vmatprep.subr.bf16.mxu0 %v452_v0  ;;  %v308_v9 = vpack.c.bf16 %v153_v8, %v152_v7  ;;  %v269_v10 = vld [vmem:[%s573_s2] ss:$0 sm:$0xff]  ;;  %s393_s2 = scalar_lea.vmem %s241_s9, 256  ;;  %p398_p11 = scmp.lt.s32.totalorder %s241_s9, %s241_s9 }
  0x3c   :  { %305 = vmatprep.subr.bf16.mxu1 %v304_v5  ;;  %p394_p10 = scmp.ne.s32.totalorder %s241_s9, %s393_s2  ;;  %p399_p12 = scmp.lt.s32.totalorder %s393_s2, %s393_s2 }
  0x3d   :  { %307 = vmatpush3.bf16.msra.mxu1 %v304_v5 }
  0x3e   :  { %288 = vmatpush3.bf16.msra.mxu0 %v325_v2  ;;  %309 = vmatprep.subr.bf16.mxu1 %v308_v9  ;;  %p400_p13 = por %p399_p12, %p398_p11 }
  0x40   :  { %p401_p0 = pnand %p400_p13, %p394_p10 }
  0x41   :  { %290 = vmatmul.mubr.msk.bf16.vlgmr.msra.gmra.mrb[0].mxu0 %vm93_vm1, %v326_v6  ;;  %311 = vmatpush3.bf16.msra.mxu1 %v308_v9 }
 0x114   :  { %v131_v11 = vpop.f32.mrb[0].mxu0 }
 0x115   :  { %v132_v12 = vadd.f32 %v269_v10, %v131_v11  ;;  %v291_v13 = vpop.f32.mrb[1].mxu0 }
 0x116   :  { %v134_v14 = vpop.f32.mrb[2].mxu0 }
 0x117   :  { %v138_v15 = vmax.f32 %v132_v12, 0.0  ;;  %v135_v16 = vadd.f32 %v269_v10, %v134_v14  ;;  %v292_v17 = vpop.f32.mrb[3].mxu0 }
 0x119   :  { %v139_v18 = vmax.f32 %v135_v16, 0.0  ;;  %142 = vrot.lane.b32.xlu0 %v138_v15, %s454_s7  ;;  %301 = vmatprep.mubr.msk.f32.mxu1 %vm93_vm1, %v138_v15 }
 0x11b   :  { %302 = vmatmul.mubr.msk.f32.vlgmr.msra.gmra.mrb[0].mxu1 %vm93_vm1, %v139_v18 }
 0x11d   :  { %144 = vrot.lane.b32.xlu0 %v139_v18, %s454_s7 }
 0x18b   :  { %v143_v19 = vpop.permute.xlu0 %142 }
 0x18c   :  { %148 = vst.msk [vmem:[#allocation8] sm:$0xff] %vm93_vm1, %v143_v19 }
 0x18f   :  { %v145_v20 = vpop.permute.xlu0 %144 }
 0x190   :  { %149 = vst.msk [vmem:[#allocation8 + $0x8] sm:$0xff] %vm93_vm1, %v145_v20 }
 0x191   :  { %404 = shalt.err (!%p401_p0)
}
 0x192   :  { %s405_s12 = scalar_lea.hbm %s575_s4, 256 }
 0x193   :  { %p406_p1 = scmp.ne.s32.totalorder %s575_s4, %s405_s12  ;;  %p409_p2 = scmp.lt.u32.totalorder %s405_s12, %s575_s4 }
 0x195   :  { %p411_p3 = pnand %p409_p2, %p406_p1 }
 0x197   :  { %414 = shalt.err (!%p411_p3)
}
 0x198   :  { %246 = dma.vmem_to_hbm [thread:$0]  %s241_s9, 256, %s575_s4, [#allocation4], %s450_s0, %s450_s0, %s451_s21  }
 0x199   :  { %s456_s18 = smov [#allocation9]  }
 0x19a   :  { %s252_s19 = sshll.u32 %s456_s18, 4  ;;  %s253_s19 = int_to_ptr.vmem [resolvable:$true] %s252_s19 }
 0x19b   :  { %s415_s20 = scalar_lea.vmem %s253_s19, 256  ;;  %p420_p5 = scmp.lt.s32.totalorder %s253_s19, %s253_s19 }
 0x19c   :  { %p416_p4 = scmp.ne.s32.totalorder %s253_s19, %s415_s20  ;;  %p421_p6 = scmp.lt.s32.totalorder %s415_s20, %s415_s20 }
 0x19e   :  { %p422_p7 = por %p421_p6, %p420_p5 }
 0x1a0   :  { %p423_p8 = pnand %p422_p7, %p416_p4 }
 0x1ee   :  { %v303_v21 = vpop.f32.mrb[0].mxu1 }
 0x1ef   :  { %234 = vst [vmem:[#allocation9 + $0x8] sm:$0xff] %v303_v21  ;;  %v224_v22 = vpop.f32.mrb[1].mxu1 }
 0x1f0   :  { %233 = vst [vmem:[#allocation9] sm:$0xff] %v224_v22 }
 0x1f1   :  { %426 = shalt.err (!%p423_p8)
}
 0x1f2   :  { %s427_s24 = scalar_lea.hbm %s576_s5, 256 }
 0x1f3   :  { %p428_p9 = scmp.ne.s32.totalorder %s576_s5, %s427_s24  ;;  %p431_p10 = scmp.lt.u32.totalorder %s427_s24, %s576_s5 }
 0x1f5   :  { %p433_p11 = pnand %p431_p10, %p428_p9 }
 0x1f7   :  { %436 = shalt.err (!%p433_p11)
}
 0x1f8   :  { %258 = dma.vmem_to_hbm [thread:$0]  %s253_s19, 256, %s576_s5, [#allocation10], %s450_s0, %s450_s0, %s451_s21  }
 0x1f9   :  { %441 = dma.done.wait [#allocation4], 256  }
 0x1fa   :  { %442 = vsyncadd [#allocation4], 4294967040 }
 0x1fb   :  { %443 = dma.done.wait [#allocation10], 256  }
 0x1fc   :  { %444 = vsyncadd [#allocation10], 4294967040 }
 0x1fd   :  { %265 = vsyncpa [#allocation3], 1 }
 0x1fe   :  { %266 = vsyncpa [#allocation6], 1 }
 0x1ff   :  { %267 = vsyncpa [#allocation4], 1 }
 0x200   :  { %268 = vsyncpa [#allocation10], 1 }

</bundles_post_ra>
